<compile_context>
chip_gen: v7x
topology: tpu7x:2x2x1
jax: 0.10.0
libtpu: 0.0.40
codegen_flags: <defaults>
</compile_context>

<pallas_src>
import jax
import jax.numpy as jnp
from jax.experimental import pallas as pl
from jax.experimental.pallas import tpu as pltpu


def multi_map_kernel(x_ref, y_ref, o_ref):
    # x_ref: (tm, tn) tile of x; y_ref: (1, tn) broadcast vector; o_ref: (tm, tn).
    # Fold torch_map #1/#2/#3 into one add: compute 3*y once on the tiny block
    # (in f32 for a tight error bound), then a single full-tile, lane-dense store.
    y = y_ref[...].astype(jnp.float32)
    y3 = (y + y + y).astype(x_ref.dtype)          # (1, tn) — cheap, small block
    o_ref[...] = x_ref[...] + y3                  # broadcasts over the row axis


def multi_map_forward(x: jax.Array, y: jax.Array) -> jax.Array:
    """Equivalent of MultiMapModel.forward: out = ((x + y) + y) + y (row-wise broadcast)."""
    M, N = x.shape
    assert y.shape == (N,), f"y must be ({N},), got {y.shape}"

    # ---- Fast path: tiny or narrow problems (incl. the native (5,3) shape). ----
    # An output last dim << 128 forces masked partial stores and the fixed
    # pallas_call/grid overhead dwarfs the compute; plain XLA fusion wins.
    if N < 128 or (M * N) < 8 * 128:
        return ((x + y) + y) + y

    dtype_bytes = jnp.dtype(x.dtype).itemsize
    sublane = max(8, 32 // dtype_bytes)           # 8 for f32, 16 for bf16, 32 for int8

    # ---- Lane (N) tile: lane-dense, multiple of 128 (or the full dim). ----
    TN_MAX = 2048
    if N <= TN_MAX:
        tn = N                                    # full-dim block is always legal
    else:
        tn = TN_MAX                               # multiple of 128; tail block masked if needed

    # ---- Row (M) tile: ~2 MiB payload/step, sublane-aligned, >= 2 row steps. ----
    TARGET_BYTES = 2 * 1024 * 1024
    if M <= sublane:
        tm = M                                    # full-dim block (legal exception)
    else:
        tm_target = max(sublane, TARGET_BYTES // (tn * dtype_bytes))
        tm_half = -(-M // 2)                      # ceil(M/2): keep >= 2 steps for v7x megacore
        tm = min(tm_target, tm_half, M)
        tm = max(sublane, (tm // sublane) * sublane)

    y2 = y.reshape(1, N)
    nj = pl.cdiv(N, tn)                           # column tiles (outer grid axis)
    ni = pl.cdiv(M, tm)                           # row tiles    (inner grid axis)

    out = pl.pallas_call(
        multi_map_kernel,
        out_shape=jax.ShapeDtypeStruct((M, N), x.dtype),
        grid=(nj, ni),                            # N outer -> y block index constant over inner sweep
        in_specs=[
            pl.BlockSpec((tm, tn), lambda j, i: (i, j)),   # x: streamed (row, lane) tiles
            pl.BlockSpec((1, tn), lambda j, i: (0, j)),    # y: resident across the inner row sweep
        ],
        out_specs=pl.BlockSpec((tm, tn), lambda j, i: (i, j)),
        compiler_params=pltpu.CompilerParams(
            dimension_semantics=("parallel", "parallel"),  # shard across TCs on v7x
            vmem_limit_bytes=48 * 1024 * 1024,             # fits v7x's 64 MiB; ample on v5e/v6e
        ),
    )(x, y2)
    return out


if __name__ == "__main__":
    key = jax.random.PRNGKey(0)
    k1, k2, k3, k4 = jax.random.split(key, 4)

    # 1) Module-native shapes from get_random_inputs(): x=(5, 3), y=(3,) -> fast path.
    x_small = jax.random.normal(k1, (5, 3), dtype=jnp.float32)
    y_small = jax.random.normal(k2, (3,), dtype=jnp.float32)
    out_small = multi_map_forward(x_small, y_small)
    jax.block_until_ready(out_small)
    ref_small = x_small + 3.0 * y_small[None, :]
    assert out_small.shape == x_small.shape and out_small.dtype == x_small.dtype
    assert jnp.allclose(out_small, ref_small, atol=1e-5, rtol=1e-5), "fast-path mismatch"

    # 2) Larger (still small) shape that exercises the tiled Pallas path:
    #    2x2 grid (2 lane tiles of 2048, 2 row tiles of 32), lane-dense stores.
    x_big = jax.random.normal(k3, (64, 4096), dtype=jnp.float32)
    y_big = jax.random.normal(k4, (4096,), dtype=jnp.float32)
    out_big = multi_map_forward(x_big, y_big)
    jax.block_until_ready(out_big)
    ref_big = x_big + 3.0 * y_big[None, :]
    assert out_big.shape == x_big.shape and out_big.dtype == x_big.dtype
    assert jnp.allclose(out_big, ref_big, atol=1e-5, rtol=1e-5), "pallas-path mismatch"

    print("KERNEL_OK")
</pallas_src>

<mosaic_0001>
module attributes {stable_mosaic.version = 11 : i64} {
  func.func @multi_map_kernel(%arg0: i32, %arg1: i32, %arg2: memref<32x2048xf32, #tpu.memory_space<vmem>>, %arg3: memref<1x2048xf32, #tpu.memory_space<vmem>>, %arg4: memref<32x2048xf32, #tpu.memory_space<vmem>>) attributes {dimension_semantics = [#tpu.dimension_semantics<parallel>, #tpu.dimension_semantics<parallel>], iteration_bounds = array<i64: 2, 2>, scalar_prefetch = 0 : i64, scratch_operands = 0 : i64, tpu.core_type = #tpu.core_type<tc>, window_params = [{transform_indices = @transform_0, window_bounds = array<i64: 32, 2048>}, {transform_indices = @transform_1, window_bounds = array<i64: 1, 2048>}, {transform_indices = @transform_2, window_bounds = array<i64: 32, 2048>}]} {
    %c0 = arith.constant 0 : index
    %c0_0 = arith.constant 0 : index
    %0 = vector.load %arg3[%c0, %c0_0] : memref<1x2048xf32, #tpu.memory_space<vmem>>, vector<1x2048xf32>
    %1 = arith.addf %0, %0 : vector<1x2048xf32>
    %2 = arith.addf %1, %0 : vector<1x2048xf32>
    %c0_1 = arith.constant 0 : index
    %c0_2 = arith.constant 0 : index
    %3 = vector.load %arg2[%c0_1, %c0_2] : memref<32x2048xf32, #tpu.memory_space<vmem>>, vector<32x2048xf32>
    %4 = vector.broadcast %2 : vector<1x2048xf32> to vector<32x2048xf32>
    %5 = arith.addf %3, %4 : vector<32x2048xf32>
    %c0_3 = arith.constant 0 : index
    %c0_4 = arith.constant 0 : index
    %6 = vector.load %arg4[%c0_3, %c0_4] : memref<32x2048xf32, #tpu.memory_space<vmem>>, vector<32x2048xf32>
    tpu.vector_store %arg4[%c0_3, %c0_4], %5 {strides = array<i32>} : memref<32x2048xf32, #tpu.memory_space<vmem>>, vector<32x2048xf32>,
    return
  }
  func.func @transform_0(%arg0: i32, %arg1: i32) -> (i32, i32) {
    %c0_i32 = arith.constant 0 : i32
    return %arg1, %arg0 : i32, i32
  }
  func.func @transform_1(%arg0: i32, %arg1: i32) -> (i32, i32) {
    %c0_i32 = arith.constant 0 : i32
    %c0_i32_0 = arith.constant 0 : i32
    return %c0_i32, %arg0 : i32, i32
  }
  func.func @transform_2(%arg0: i32, %arg1: i32) -> (i32, i32) {
    %c0_i32 = arith.constant 0 : i32
    return %arg1, %arg0 : i32, i32
  }
}

</mosaic_0001>

<bundles_post_ra>
// kernel: tpu_custom_call.1
= control target key start
LH: loop header
LB: loop body
LE: loop exit
PB: predicated region body
PF: predicated region fallthrough
CT: control target
= control target key end

     0   :  { %s1573_s0 = inlined_call_operand.hbm [shape: f32[64,4096], index: 0, kind: input, shape index: {}]   ;;  %s1574_s1 = inlined_call_operand.hbm [shape: f32[1,4096], index: 1, kind: input, shape index: {}]   ;;  %s1575_s2 = inlined_call_operand.hbm [shape: f32[64,4096], index: 2, kind: output, shape index: {}]  }
   0x1   :  { %1583 = sst [smem:[#allocation12_spill]] %s1573_s0 }
   0x2   :  { %7 = vsyncpa [#allocation3], 0 }
   0x3   :  { %9 = vsyncpa [#allocation3 + $0x1], 0 }
   0x4   :  { %10 = vsyncpa [#allocation6], 0 }
   0x5   :  { %12 = vsyncpa [#allocation6 + $0x1], 0 }
   0x6   :  { %13 = vsyncpa [#allocation4], 0 }
   0x7   :  { %15 = vsyncpa [#allocation4 + $0x1], 0  ;;  %s985_s9 = smov 0   ;;  %s987_s10 = smov 0  }
   0x8   :  { %s989_s11 = smov 0   ;;  %s991_s12 = smov 0  }
   0x9   :  { %s993_s13 = smov 0   ;;  %s995_s14 = smov 0  }
   0xa   :  { %s997_s15 = smov 0   ;;  %s999_s16 = smov 0  }
   0xb   :  { %s1001_s17 = smov 0   ;;  %s1003_s18 = smov 0  }
   0xc   :  { %s1005_s19 = smov 0  }
   0xd LB: > { %s30_s20 = sadd.s32 1, %s951_s17  ;;  %p1578_p1 = scmp.ne.s32.totalorder %s939_s14, %s935_s13  ;;  %s959_s19 = sphi %s1005_s19, %s21_s19   ;;  %s955_s18 = sphi %s1003_s18, %s1612_s18   ;;  %s951_s17 = sphi %s1001_s17, %s1611_s17   ;;  %s947_s16 = sphi %s999_s16, %s1610_s16   ;;  %s943_s15 = sphi %s997_s15, %s1609_s15   ;;  %s939_s14 = sphi %s995_s14, %s1608_s14   ;;  %s935_s13 = sphi %s993_s13, %s1607_s13   ;;  %s931_s12 = sphi %s991_s12, %s1606_s12   ;;  %s927_s11 = sphi %s989_s11, %s1605_s11   ;;  %s923_s10 = sphi %s987_s10, %s1604_s10   ;;  %s919_s9 = sphi %s985_s9, %s1603_s9  }
   0xe   : > { %p1041_p0 = scmp.ge.s32.totalorder %s30_s20, 2  ;;  %p1577_p2 = scmp.eq.s32.totalorder %s959_s19, 0 }
   0xf   : > { %s42_s22 = sadd.s32 1, %s939_s14  ;;  %p1576_p4 = scmp.lt.s32.totalorder %s959_s19, 4 }
  0x10   : > { %s1614_s20 = smov (%p1041_p0, %s30_s20), 0  ;;  %p51_p3 = por %p1577_p2, %p1578_p1 }
  0x11   : > { %s133_s23 = sand.u32 1, %s939_s14   ;;  %s640_s25 = sshll.u32 %s955_s18, 4 }
  0x12   : > { %s638_s24 = sshll.u32 %s133_s23, 9  ;;  %s657_s26 = sshll.u32 %s951_s17, 7 }
  0x13   : > { %s137_s27 = scalar_lea.vmem [#allocation2], %s638_s24  ;;  %s144_s29 = sadd.s32 %s657_s26, %s640_s25 }
  0x14   : > { %s147_s28 = sshll.u32 %s137_s27, 4  ;;  %s642_s30 = sshll.u32 %s144_s29, 7  ;;  %s1062_s28 = int_to_ptr.vmem [resolvable:$true] %s147_s28 }
  0x15   : > { %p1066_p5 = pnand %p1576_p4, %p51_p3  ;;  %s1586_s0 = sld [smem:[#allocation12_spill]] }
  0x16   : > { %s1076_s7 = scalar_lea.sflag [#allocation3], %s133_s23 }
  0x17   : > { %p775_p8 = pneg %p1066_p5 }
  0x1b   : > { %s1073_s6 = scalar_lea.hbm %s1586_s0, %s642_s30  ;;  %s778_s26 = scalar_lea.hbm %s1586_s0, 32768 }
  0x1c   : > { %s773_s8 = scalar_lea.hbm %s1073_s6, 8192  ;;  %p779_p11 = scmp.lt.u32.totalorder %s1073_s6, %s1586_s0 }
  0x1d   : > { %p774_p7 = scmp.ne.s32.totalorder %s1073_s6, %s773_s8  ;;  %p780_p12 = scmp.lt.u32.totalorder %s778_s26, %s773_s8 }
  0x1e   : > { %p782_p3 = scmp.lt.u32.totalorder %s773_s8, %s1073_s6 }
  0x1f   : > { %p776_p9 = pnand %p775_p8, %p774_p7  ;;  %p781_p13 = por %p780_p12, %p779_p11 }
  0x21   : > { %p777_p10 = pneg %p776_p9  ;;  %p783_p4 = por %p782_p3, %p781_p13 }
  0x23   : > { %p784_p2 = pnand %p783_p4, %p777_p10 }
  0x25   : > { %787 = shalt.err (!%p784_p2)
}
  0x26   : > { %s788_s23 = scalar_lea.vmem %s1062_s28, 8192  ;;  %s961_s30 = smov [#allocation2]  }
  0x27   : > { %p789_p7 = scmp.ne.s32.totalorder %s1062_s28, %s788_s23  ;;  %s793_s4 = sshll.u32 %s961_s30, 4  ;;  %s794_s4 = int_to_ptr.vmem [resolvable:$false] %s793_s4 }
  0x28   : > { %s795_s5 = scalar_lea.vmem %s794_s4, 16384  ;;  %p796_p6 = scmp.lt.s32.totalorder %s1062_s28, %s794_s4 }
  0x29   : > { %p791_p9 = pnand %p789_p7, %p775_p8  ;;  %p797_p11 = scmp.lt.s32.totalorder %s795_s5, %s788_s23 }
  0x2b   : > { %p792_p1 = pneg %p791_p9  ;;  %p798_p12 = por %p797_p11, %p796_p6 }
  0x2d   : > { %p799_p13 = pnand %p798_p12, %p792_p1 }
  0x2f   : > { %802 = shalt.err (!%p799_p13)
}
  0x30   : > { %s962_s8 = smov 4096   ;;  %s963_s24 = smov 2048  }
  0x31   : > { %s964_s25 = smov 128   ;;  %p174_p1 = scmp.lt.s32.totalorder %s959_s19, 5 }
  0x32   : > { %669 = dma.hbm_to_vmem [thread:$0]  (!%p1066_p5), %s1073_s6, 8192, %s1062_s28, %s1076_s7, %s962_s8, %s963_s24, %s964_s25  }
  0x33   : > { %p1587_p2 = scmp.ge.s32.totalorder %s959_s19, 1  ;;  %s37_s27 = ssub.s32 %s951_s17, %s1614_s20 }
  0x34   : > { %s634_s29 = sadd.s32 4294967295, %s959_s19   ;;  %s33_s23 = sadd.s32 1, %s955_s18 }
  0x35   : > { %p1107_p4 = pnand %p1587_p2, %p174_p1  ;;  %p55_p6 = scmp.ne.s32.totalorder %s935_s13, %s931_s12 }
  0x36   : > { %s1616_s23 = smov (!%p1041_p0, %s33_s23), %s955_s18  ;;  %s635_s3 = sadd.s32 4294967294, %s959_s19  }
  0x37   : > { %p56_p5 = scmp.eq.s32.totalorder %s634_s29, 0  ;;  %p35_p8 = scmp.ge.s32.totalorder %s1616_s23, 2 }
  0x38   : > { %s68_s28 = sadd.s32 1, %s927_s11  ;;  %p81_p3 = scmp.ne.s32.totalorder %s923_s10, %s919_s9 }
  0x39   : > { %p1125_p10 = por %p56_p5, %p55_p6  ;;  %s1618_s23 = smov (%p35_p8, %s1616_s23), 0 }
  0x3a   : > { %1590 = sst [smem:[#allocation11_spill]] %s1618_s23  ;;  %p75_p0 = scmp.ne.s32.totalorder %s927_s11, %s923_s10 }
  0x3b   : > { %s1589_s6 = scalar_select %p1125_p10, 1, 0 }
  0x3c   : > { %p1135_p7 = por %p81_p3, %p56_p5  ;;  %s38_s7 = ssub.s32 %s955_s18, %s1618_s23 }
  0x3d   : > { %p107_p9 = scmp.eq.s32.totalorder %s634_s29, 3  ;;  %s39_s30 = sor.u32 %s38_s7, %s37_s27 }
  0x3e   : > { %s1591_s21 = scalar_select %p1135_p7, 1, 0 }
  0x3f   : > { %p66_p11 = scmp.eq.s32.totalorder %s38_s7, 0  ;;  %p40_p12 = scmp.eq.s32.totalorder %s39_s30, 0 }
  0x40   : > { %p1592_p13 = scmp.ne.s32.totalorder %s939_s14, %s935_s13  ;;  %p113_p2 = scmp.eq.s32.totalorder %s635_s3, 3 }
  0x41   : > { %s1149_s4 = scalar_select %p66_p11, %s927_s11, %s68_s28  }
  0x42   : > { %p1144_p1 = por %p107_p9, %p1592_p13  ;;  %s157_s8 = sand.u32 1, %s927_s11  }
  0x43   : > { %s1154_s5 = scalar_select %p40_p12, %s939_s14, %s42_s22  }
  0x44   : > { %s1593_s9 = scalar_select %p1144_p1, 1, 0 }
  0x45   : > { %p1594_p5 = scmp.eq.s32.totalorder %s959_s19, 0  ;;  %s643_s24 = sshll.u32 %s157_s8, 4 }
  0x46   : > { %p1162_p3 = por %p113_p2, %p55_p6  ;;  %s658_s27 = sshll.u32 %s955_s18, 8 }
  0x47   : > { %p77_p8 = por %p75_p0, %p1594_p5  ;;  %s161_s29 = scalar_lea.vmem [#allocation5], %s643_s24 }
  0x48   : > { %s1595_s25 = scalar_select %p1162_p3, 1, 0 }
  0x49   : > { %s169_s7 = sshll.u32 %s161_s29, 4  ;;  %s1170_s28 = scalar_lea.hbm %s1574_s1, %s658_s27  ;;  %s1172_s7 = int_to_ptr.vmem [resolvable:$true] %s169_s7 }
  0x4a   : > { %p1596_p0 = scmp.lt.s32.totalorder %s959_s19, 4  ;;  %s158_s3 = scalar_lea.sflag [#allocation6], %s157_s8 }
  0x4b   : > { %s803_s24 = scalar_lea.hbm %s1170_s28, 256  ;;  %s808_s29 = scalar_lea.hbm %s1574_s1, 512 }
  0x4c   : > { %p1176_p9 = pnand %p1596_p0, %p77_p8  ;;  %p804_p6 = scmp.ne.s32.totalorder %s1170_s28, %s803_s24 }
  0x4d   : > { %p809_p2 = scmp.lt.u32.totalorder %s1170_s28, %s1574_s1  ;;  %p810_p5 = scmp.lt.u32.totalorder %s808_s29, %s803_s24 }
  0x4e   : > { %p805_p11 = pneg %p1176_p9  ;;  %p812_p0 = scmp.lt.u32.totalorder %s803_s24, %s1170_s28 }
  0x4f   : > { %p811_p8 = por %p810_p5, %p809_p2 }
  0x50   : > { %p806_p12 = pnand %p805_p11, %p804_p6 }
  0x51   : > { %p813_p3 = por %p812_p0, %p811_p8 }
  0x52   : > { %p807_p13 = pneg %p806_p12 }
  0x54   : > { %p814_p1 = pnand %p813_p3, %p807_p13 }
  0x56   : > { %817 = shalt.err (!%p814_p1)
}
  0x57   : > { %s818_s8 = scalar_lea.vmem %s1172_s7, 256  ;;  %s965_s0 = smov [#allocation5]  }
  0x58   : > { %p819_p6 = scmp.ne.s32.totalorder %s1172_s7, %s818_s8  ;;  %s823_s27 = sshll.u32 %s965_s0, 4  ;;  %s824_s27 = int_to_ptr.vmem [resolvable:$false] %s823_s27 }
  0x59   : > { %s825_s23 = scalar_lea.vmem %s824_s27, 512  ;;  %p826_p10 = scmp.lt.s32.totalorder %s1172_s7, %s824_s27 }
  0x5a   : > { %p821_p12 = pnand %p819_p6, %p805_p11  ;;  %p827_p2 = scmp.lt.s32.totalorder %s825_s23, %s818_s8 }
  0x5c   : > { %p822_p7 = pneg %p821_p12  ;;  %p828_p5 = por %p827_p2, %p826_p10 }
  0x5e   : > { %p829_p8 = pnand %p828_p5, %p822_p7 }
  0x60   : > { %832 = shalt.err (!%p829_p8)
}
  0x61   : > { %672 = dma.hbm_to_vmem [thread:$0]  (!%p1176_p9), %s1170_s28, 256, %s1172_s7, %s158_s3  }
  0x62   : > { %178 = sbr.rel (%p1107_p4) target bundleno = 168 (0xa8), region = 28  ;;  %s1208_s24 = sand.u32 (!%p1107_p4), 1, %s935_s13  }
  0x63   : > { %s647_s29 = sshll.u32 (!%p1107_p4), %s1208_s24, 9  ;;  %s181_s30 = scalar_lea.sflag (!%p1107_p4), [#allocation3], %s1208_s24 }
  0x64   : > { %s1214_s8 = scalar_lea.vmem (!%p1107_p4), [#allocation2], %s647_s29  ;;  %p1598_p10 = scmp.ne.s32.totalorder (!%p1107_p4), %s1589_s6, 0 }
  0x69   : > { %906 = dma.done.wait (%p1598_p10), %s181_s30, 8192  }
  0x6a   : > { %908 = vsyncadd (%p1598_p10), %s181_s30, 4294959104  ;;  %s189_s26 = sand.u32 1, %s923_s10   ;;  %p1599_p4 = scmp.ne.s32.totalorder %s1591_s21, 0 }
  0x6b   : > { %s648_s7 = sshll.u32 %s189_s26, 4  ;;  %s190_s28 = scalar_lea.sflag [#allocation6], %s189_s26 }
  0x6c   : > { %s193_s22 = scalar_lea.vmem [#allocation5], %s648_s7 }
  0x6d   : > { %910 = dma.done.wait (%p1599_p4), %s190_s28, 256  }
  0x6e   : > { %912 = vsyncadd (%p1599_p4), %s190_s28, 4294967040  ;;  %v296_v0 = vlaneseq  ;;  %v224_v2 = vld [vmem:[%s193_s22] sm:$0xff]  ;;  %v231_v14 = vld [vmem:[%s1214_s8 + $0x8] sm:$0xff]  ;;  %s1296_s6 = scalar_lea.vmem [#allocation7], %s647_s29  ;;  %s652_s21 = sshll.u32 %s947_s16, 4 }
  0x6f   : > { %v226_v4 = vadd.f32 %v224_v2, %v224_v2  ;;  %v230_v13 = vld [vmem:[%s1214_s8] sm:$0xff]  ;;  %v225_v15 = vld [vmem:[%s193_s22 + $0x8] sm:$0xff]  ;;  %v232_v16 = vld [vmem:[%s1214_s8 + $0x10] sm:$0xff]  ;;  %s659_s3 = sshll.u32 %s943_s15, 7  ;;  %s521_s15 = sshll.u32 %s1296_s6, 4  ;;  %s1487_s15 = int_to_ptr.vmem [resolvable:$true] %s521_s15 }
  0x70   : > { %v1225_v1 = vshrl.u32 %v296_v0, 7  ;;  %v233_v17 = vld [vmem:[%s1214_s8 + $0x18] sm:$0xff]  ;;  %v234_v18 = vld [vmem:[%s1214_s8 + $0x20] sm:$0xff]  ;;  %v227_v19 = vadd.f32 %v225_v15, %v225_v15  ;;  %v235_v24 = vld [vmem:[%s1214_s8 + $0x28] sm:$0xff]  ;;  %s1433_s0 = sadd.s32 %s659_s3, %s652_s21  ;;  %s505_s30 = scalar_lea.sflag [#allocation4], %s1208_s24 }
  0x71   : > { %v228_v12 = vadd.f32 %v226_v4, %v224_v2  ;;  %v236_v25 = vld [vmem:[%s1214_s8 + $0x30] sm:$0xff]  ;;  %v237_v26 = vld [vmem:[%s1214_s8 + $0x38] sm:$0xff]  ;;  %v246_v31 = vld [vmem:[%s1214_s8 + $0x80] sm:$0xff]  ;;  %s654_s16 = sshll.u32 %s1433_s0, 7  ;;  %p1600_p1 = scmp.ne.s32.totalorder %s1593_s9, 0 }
  0x72   : > { %v298_v3 = vsub.s32 0, %v1225_v1  ;;  %v302_v5 = vsub.s32 1, %v1225_v1  ;;  %v306_v6 = vsub.s32 2, %v1225_v1  ;;  %v310_v7 = vsub.s32 3, %v1225_v1  ;;  %v247_v32 = vld [vmem:[%s1214_s8 + $0x88] sm:$0xff]  ;;  %v248_v33 = vld [vmem:[%s1214_s8 + $0x90] sm:$0xff]  ;;  %s1500_s29 = scalar_lea.hbm %s1575_s2, %s654_s16 }
  0x73   : > { %v314_v8 = vsub.s32 4, %v1225_v1  ;;  %v318_v9 = vsub.s32 5, %v1225_v1  ;;  %v322_v10 = vsub.s32 6, %v1225_v1  ;;  %v326_v11 = vsub.s32 7, %v1225_v1  ;;  %v249_v38 = vld [vmem:[%s1214_s8 + $0x98] sm:$0xff]  ;;  %v250_v39 = vld [vmem:[%s1214_s8 + $0xa0] sm:$0xff] }
  0x74   : > { %v1242_v20 = vrot.slane %v228_v12, %v298_v3  ;;  %v1246_v21 = vrot.slane %v228_v12, %v302_v5  ;;  %v1250_v22 = vrot.slane %v228_v12, %v306_v6  ;;  %v1254_v23 = vrot.slane %v228_v12, %v310_v7  ;;  %v251_v40 = vld [vmem:[%s1214_s8 + $0xa8] sm:$0xff]  ;;  %v238_v45 = vld [vmem:[%s1214_s8 + $0x40] sm:$0xff]  ;;  %v240_v47 = vld [vmem:[%s1214_s8 + $0x50] sm:$0xff]  ;;  %s966_s26 = smov [#allocation7]  }
  0x75   : > { %v1261_v27 = vrot.slane %v228_v12, %v314_v8  ;;  %v1265_v28 = vrot.slane %v228_v12, %v318_v9  ;;  %v1269_v29 = vrot.slane %v228_v12, %v322_v10  ;;  %v1273_v30 = vrot.slane %v228_v12, %v326_v11  ;;  %v239_v46 = vld [vmem:[%s1214_s8 + $0x48] sm:$0xff]  ;;  %v241_v48 = vld [vmem:[%s1214_s8 + $0x58] sm:$0xff]  ;;  %v252_v49 = vld [vmem:[%s1214_s8 + $0xb0] sm:$0xff]  ;;  %s837_s7 = sshll.u32 %s966_s26, 4  ;;  %s838_s7 = int_to_ptr.vmem [resolvable:$false] %s837_s7 }
  0x76   : > { %v376_v34 = vadd.f32 %v1242_v20, %v230_v13  ;;  %v377_v35 = vadd.f32 %v1246_v21, %v231_v14  ;;  %v378_v36 = vadd.f32 %v1250_v22, %v232_v16  ;;  %v379_v37 = vadd.f32 %v1254_v23, %v233_v17  ;;  %v242_v51 = vld [vmem:[%s1214_s8 + $0x60] sm:$0xff]  ;;  %v243_v52 = vld [vmem:[%s1214_s8 + $0x68] sm:$0xff]  ;;  %v244_v53 = vld [vmem:[%s1214_s8 + $0x70] sm:$0xff]  ;;  %s839_s28 = scalar_lea.vmem %s838_s7, 16384  ;;  %p840_p11 = scmp.lt.s32.totalorder %s1487_s15, %s838_s7 }
  0x77   : > { %v380_v41 = vadd.f32 %v1261_v27, %v234_v18  ;;  %v381_v42 = vadd.f32 %v1265_v28, %v235_v24  ;;  %v382_v43 = vadd.f32 %v1269_v29, %v236_v25  ;;  %v383_v44 = vadd.f32 %v1273_v30, %v237_v26  ;;  %v245_v54 = vld [vmem:[%s1214_s8 + $0x78] sm:$0xff]  ;;  %v254_v63 = vld [vmem:[%s1214_s8 + $0xc0] sm:$0xff]  ;;  %v255_v0 = vld [vmem:[%s1214_s8 + $0xc8] sm:$0xff] }
  0x78   : > { %440 = vst [vmem:[%s1296_s6] sm:$0xff] %v376_v34  ;;  %441 = vst [vmem:[%s1296_s6 + $0x8] sm:$0xff] %v377_v35  ;;  %v229_v50 = vadd.f32 %v227_v19, %v225_v15  ;;  %v392_v55 = vadd.f32 %v1242_v20, %v246_v31  ;;  %v393_v56 = vadd.f32 %v1246_v21, %v247_v32  ;;  %v253_v62 = vld [vmem:[%s1214_s8 + $0xb8] sm:$0xff]  ;;  %v256_v2 = vld [vmem:[%s1214_s8 + $0xd0] sm:$0xff] }
  0x79   : > { %442 = vst [vmem:[%s1296_s6 + $0x10] sm:$0xff] %v378_v36  ;;  %443 = vst [vmem:[%s1296_s6 + $0x18] sm:$0xff] %v379_v37  ;;  %v394_v57 = vadd.f32 %v1250_v22, %v248_v33  ;;  %v395_v58 = vadd.f32 %v1254_v23, %v249_v38  ;;  %v396_v59 = vadd.f32 %v1261_v27, %v250_v39  ;;  %v259_v15 = vld [vmem:[%s1214_s8 + $0xe8] sm:$0xff]  ;;  %v260_v16 = vld [vmem:[%s1214_s8 + $0xf0] sm:$0xff] }
  0x7a   : > { %444 = vst [vmem:[%s1296_s6 + $0x20] sm:$0xff] %v380_v41  ;;  %445 = vst [vmem:[%s1296_s6 + $0x28] sm:$0xff] %v381_v42  ;;  %v397_v60 = vadd.f32 %v1265_v28, %v251_v40  ;;  %v398_v61 = vadd.f32 %v1269_v29, %v252_v49  ;;  %v1323_v4 = vrot.slane %v229_v50, %v298_v3  ;;  %v257_v3 = vld [vmem:[%s1214_s8 + $0xd8] sm:$0xff]  ;;  %v262_v19 = vld [vmem:[%s1214_s8 + $0x100] sm:$0xff] }
  0x7b   : > { %446 = vst [vmem:[%s1296_s6 + $0x30] sm:$0xff] %v382_v43  ;;  %447 = vst [vmem:[%s1296_s6 + $0x38] sm:$0xff] %v383_v44  ;;  %v1327_v12 = vrot.slane %v229_v50, %v302_v5  ;;  %v1331_v13 = vrot.slane %v229_v50, %v306_v6  ;;  %v1335_v14 = vrot.slane %v229_v50, %v310_v7  ;;  %v258_v5 = vld [vmem:[%s1214_s8 + $0xe0] sm:$0xff]  ;;  %v264_v24 = vld [vmem:[%s1214_s8 + $0x110] sm:$0xff] }
  0x7c   : > { %456 = vst [vmem:[%s1296_s6 + $0x80] sm:$0xff] %v392_v55  ;;  %457 = vst [vmem:[%s1296_s6 + $0x88] sm:$0xff] %v393_v56  ;;  %v1346_v6 = vrot.slane %v229_v50, %v314_v8  ;;  %v1350_v7 = vrot.slane %v229_v50, %v318_v9  ;;  %v1354_v17 = vrot.slane %v229_v50, %v322_v10  ;;  %v261_v8 = vld [vmem:[%s1214_s8 + $0xf8] sm:$0xff]  ;;  %v263_v9 = vld [vmem:[%s1214_s8 + $0x108] sm:$0xff] }
  0x7d   : > { %458 = vst [vmem:[%s1296_s6 + $0x90] sm:$0xff] %v394_v57  ;;  %v1358_v18 = vrot.slane %v229_v50, %v326_v11  ;;  %459 = vst [vmem:[%s1296_s6 + $0x98] sm:$0xff] %v395_v58  ;;  %v384_v10 = vadd.f32 %v1323_v4, %v238_v45  ;;  %v385_v1 = vadd.f32 %v1327_v12, %v239_v46  ;;  %v265_v26 = vld [vmem:[%s1214_s8 + $0x118] sm:$0xff]  ;;  %v266_v31 = vld [vmem:[%s1214_s8 + $0x120] sm:$0xff] }
  0x7e   : > { %460 = vst [vmem:[%s1296_s6 + $0xa0] sm:$0xff] %v396_v59  ;;  %461 = vst [vmem:[%s1296_s6 + $0xa8] sm:$0xff] %v397_v60  ;;  %v386_v11 = vadd.f32 %v1331_v13, %v240_v47  ;;  %v387_v25 = vadd.f32 %v1335_v14, %v241_v48  ;;  %v267_v32 = vld [vmem:[%s1214_s8 + $0x128] sm:$0xff]  ;;  %v268_v33 = vld [vmem:[%s1214_s8 + $0x130] sm:$0xff]  ;;  %v388_v34 = vadd.f32 %v1346_v6, %v242_v51 }
  0x7f   : > { %462 = vst [vmem:[%s1296_s6 + $0xb0] sm:$0xff] %v398_v61  ;;  %v389_v35 = vadd.f32 %v1350_v7, %v243_v52  ;;  %v390_v36 = vadd.f32 %v1354_v17, %v244_v53  ;;  %v391_v37 = vadd.f32 %v1358_v18, %v245_v54  ;;  %v269_v38 = vld [vmem:[%s1214_s8 + $0x138] sm:$0xff]  ;;  %v270_v39 = vld [vmem:[%s1214_s8 + $0x140] sm:$0xff]  ;;  %v271_v40 = vld [vmem:[%s1214_s8 + $0x148] sm:$0xff]  ;;  %v399_v41 = vadd.f32 %v1273_v30, %v253_v62 }
  0x80   : > { %448 = vst [vmem:[%s1296_s6 + $0x40] sm:$0xff] %v384_v10  ;;  %449 = vst [vmem:[%s1296_s6 + $0x48] sm:$0xff] %v385_v1  ;;  %v400_v42 = vadd.f32 %v1323_v4, %v254_v63  ;;  %v401_v43 = vadd.f32 %v1327_v12, %v255_v0  ;;  %v402_v44 = vadd.f32 %v1331_v13, %v256_v2  ;;  %v272_v45 = vld [vmem:[%s1214_s8 + $0x150] sm:$0xff]  ;;  %v273_v46 = vld [vmem:[%s1214_s8 + $0x158] sm:$0xff] }
  0x81   : > { %450 = vst [vmem:[%s1296_s6 + $0x50] sm:$0xff] %v386_v11  ;;  %451 = vst [vmem:[%s1296_s6 + $0x58] sm:$0xff] %v387_v25  ;;  %v274_v47 = vld [vmem:[%s1214_s8 + $0x160] sm:$0xff]  ;;  %v403_v48 = vadd.f32 %v1335_v14, %v257_v3  ;;  %v404_v49 = vadd.f32 %v1346_v6, %v258_v5  ;;  %v405_v50 = vadd.f32 %v1350_v7, %v259_v15  ;;  %v275_v52 = vld [vmem:[%s1214_s8 + $0x168] sm:$0xff] }
  0x82   : > { %452 = vst [vmem:[%s1296_s6 + $0x60] sm:$0xff] %v388_v34  ;;  %453 = vst [vmem:[%s1296_s6 + $0x68] sm:$0xff] %v389_v35  ;;  %v406_v51 = vadd.f32 %v1354_v17, %v260_v16  ;;  %v276_v53 = vld [vmem:[%s1214_s8 + $0x170] sm:$0xff]  ;;  %v277_v54 = vld [vmem:[%s1214_s8 + $0x178] sm:$0xff]  ;;  %v407_v55 = vadd.f32 %v1358_v18, %v261_v8  ;;  %v408_v56 = vadd.f32 %v1242_v20, %v262_v19 }
  0x83   : > { %454 = vst [vmem:[%s1296_s6 + $0x70] sm:$0xff] %v390_v36  ;;  %455 = vst [vmem:[%s1296_s6 + $0x78] sm:$0xff] %v391_v37  ;;  %v409_v57 = vadd.f32 %v1246_v21, %v263_v9  ;;  %v410_v58 = vadd.f32 %v1250_v22, %v264_v24  ;;  %v278_v59 = vld [vmem:[%s1214_s8 + $0x180] sm:$0xff]  ;;  %v279_v60 = vld [vmem:[%s1214_s8 + $0x188] sm:$0xff]  ;;  %v411_v62 = vadd.f32 %v1254_v23, %v265_v26 }
  0x84   : > { %463 = vst [vmem:[%s1296_s6 + $0xb8] sm:$0xff] %v399_v41  ;;  %464 = vst [vmem:[%s1296_s6 + $0xc0] sm:$0xff] %v400_v42  ;;  %v280_v61 = vld [vmem:[%s1214_s8 + $0x190] sm:$0xff]  ;;  %v412_v63 = vadd.f32 %v1261_v27, %v266_v31  ;;  %v413_v0 = vadd.f32 %v1265_v28, %v267_v32  ;;  %v414_v2 = vadd.f32 %v1269_v29, %v268_v33  ;;  %v281_v3 = vld [vmem:[%s1214_s8 + $0x198] sm:$0xff] }
  0x85   : > { %465 = vst [vmem:[%s1296_s6 + $0xc8] sm:$0xff] %v401_v43  ;;  %466 = vst [vmem:[%s1296_s6 + $0xd0] sm:$0xff] %v402_v44  ;;  %v282_v5 = vld [vmem:[%s1214_s8 + $0x1a0] sm:$0xff]  ;;  %v283_v15 = vld [vmem:[%s1214_s8 + $0x1a8] sm:$0xff]  ;;  %v415_v16 = vadd.f32 %v1273_v30, %v269_v38  ;;  %v416_v8 = vadd.f32 %v1323_v4, %v270_v39  ;;  %v417_v19 = vadd.f32 %v1327_v12, %v271_v40 }
  0x86   : > { %467 = vst [vmem:[%s1296_s6 + $0xd8] sm:$0xff] %v403_v48  ;;  %468 = vst [vmem:[%s1296_s6 + $0xe0] sm:$0xff] %v404_v49  ;;  %v418_v9 = vadd.f32 %v1331_v13, %v272_v45  ;;  %v284_v24 = vld [vmem:[%s1214_s8 + $0x1b0] sm:$0xff]  ;;  %v285_v10 = vld [vmem:[%s1214_s8 + $0x1b8] sm:$0xff]  ;;  %v419_v11 = vadd.f32 %v1335_v14, %v273_v46  ;;  %v420_v25 = vadd.f32 %v1346_v6, %v274_v47 }
  0x87   : > { %469 = vst [vmem:[%s1296_s6 + $0xe8] sm:$0xff] %v405_v50  ;;  %470 = vst [vmem:[%s1296_s6 + $0xf0] sm:$0xff] %v406_v51  ;;  %v286_v1 = vld [vmem:[%s1214_s8 + $0x1c0] sm:$0xff]  ;;  %v421_v26 = vadd.f32 %v1350_v7, %v275_v52  ;;  %v422_v31 = vadd.f32 %v1354_v17, %v276_v53  ;;  %v287_v32 = vld [vmem:[%s1214_s8 + $0x1c8] sm:$0xff]  ;;  %v423_v35 = vadd.f32 %v1358_v18, %v277_v54 }
  0x88   : > { %471 = vst [vmem:[%s1296_s6 + $0xf8] sm:$0xff] %v407_v55  ;;  %472 = vst [vmem:[%s1296_s6 + $0x100] sm:$0xff] %v408_v56  ;;  %v288_v33 = vld [vmem:[%s1214_s8 + $0x1d0] sm:$0xff]  ;;  %v289_v34 = vld [vmem:[%s1214_s8 + $0x1d8] sm:$0xff]  ;;  %v424_v36 = vadd.f32 %v1242_v20, %v278_v59  ;;  %v425_v37 = vadd.f32 %v1246_v21, %v279_v60  ;;  %v426_v38 = vadd.f32 %v1250_v22, %v280_v61 }
  0x89   : > { %473 = vst [vmem:[%s1296_s6 + $0x108] sm:$0xff] %v409_v57  ;;  %474 = vst [vmem:[%s1296_s6 + $0x110] sm:$0xff] %v410_v58  ;;  %v290_v39 = vld [vmem:[%s1214_s8 + $0x1e0] sm:$0xff]  ;;  %v291_v40 = vld [vmem:[%s1214_s8 + $0x1e8] sm:$0xff]  ;;  %v427_v20 = vadd.f32 %v1254_v23, %v281_v3  ;;  %v428_v21 = vadd.f32 %v1261_v27, %v282_v5  ;;  %v429_v22 = vadd.f32 %v1265_v28, %v283_v15 }
  0x8a   : > { %475 = vst [vmem:[%s1296_s6 + $0x118] sm:$0xff] %v411_v62  ;;  %476 = vst [vmem:[%s1296_s6 + $0x120] sm:$0xff] %v412_v63  ;;  %v292_v41 = vld [vmem:[%s1214_s8 + $0x1f0] sm:$0xff]  ;;  %v430_v42 = vadd.f32 %v1269_v29, %v284_v24  ;;  %v293_v43 = vld [vmem:[%s1214_s8 + $0x1f8] sm:$0xff]  ;;  %v431_v44 = vadd.f32 %v1273_v30, %v285_v10  ;;  %v432_v23 = vadd.f32 %v1323_v4, %v286_v1  ;;  %s833_s8 = scalar_lea.vmem %s1487_s15, 8192 }
  0x8b   : > { %477 = vst [vmem:[%s1296_s6 + $0x128] sm:$0xff] %v413_v0  ;;  %478 = vst [vmem:[%s1296_s6 + $0x130] sm:$0xff] %v414_v2  ;;  %v433_v27 = vadd.f32 %v1327_v12, %v287_v32  ;;  %v434_v45 = vadd.f32 %v1331_v13, %v288_v33  ;;  %v435_v28 = vadd.f32 %v1335_v14, %v289_v34  ;;  %p834_p7 = scmp.ne.s32.totalorder %s1487_s15, %s833_s8  ;;  %p841_p13 = scmp.lt.s32.totalorder %s839_s28, %s833_s8 }
  0x8c   : > { %479 = vst [vmem:[%s1296_s6 + $0x138] sm:$0xff] %v415_v16  ;;  %480 = vst [vmem:[%s1296_s6 + $0x140] sm:$0xff] %v416_v8  ;;  %v436_v29 = vadd.f32 %v1346_v6, %v290_v39  ;;  %v437_v30 = vadd.f32 %v1350_v7, %v291_v40  ;;  %v438_v4 = vadd.f32 %v1354_v17, %v292_v41 }
  0x8d   : > { %481 = vst [vmem:[%s1296_s6 + $0x148] sm:$0xff] %v417_v19  ;;  %482 = vst [vmem:[%s1296_s6 + $0x150] sm:$0xff] %v418_v9  ;;  %v439_v12 = vadd.f32 %v1358_v18, %v293_v43  ;;  %p835_p3 = pnand %p834_p7, %p1600_p1  ;;  %p842_p0 = por %p841_p13, %p840_p11 }
  0x8e   : > { %483 = vst [vmem:[%s1296_s6 + $0x158] sm:$0xff] %v419_v11  ;;  %484 = vst [vmem:[%s1296_s6 + $0x160] sm:$0xff] %v420_v25 }
  0x8f   : > { %485 = vst [vmem:[%s1296_s6 + $0x168] sm:$0xff] %v421_v26  ;;  %486 = vst [vmem:[%s1296_s6 + $0x170] sm:$0xff] %v422_v31  ;;  %p836_p9 = pneg %p835_p3 }
  0x90   : > { %487 = vst [vmem:[%s1296_s6 + $0x178] sm:$0xff] %v423_v35  ;;  %488 = vst [vmem:[%s1296_s6 + $0x180] sm:$0xff] %v424_v36 }
  0x91   : > { %489 = vst [vmem:[%s1296_s6 + $0x188] sm:$0xff] %v425_v37  ;;  %490 = vst [vmem:[%s1296_s6 + $0x190] sm:$0xff] %v426_v38  ;;  %p843_p6 = pnand %p842_p0, %p836_p9 }
  0x92   : > { %491 = vst [vmem:[%s1296_s6 + $0x198] sm:$0xff] %v427_v20  ;;  %492 = vst [vmem:[%s1296_s6 + $0x1a0] sm:$0xff] %v428_v21 }
  0x93   : > { %493 = vst [vmem:[%s1296_s6 + $0x1a8] sm:$0xff] %v429_v22  ;;  %494 = vst [vmem:[%s1296_s6 + $0x1b0] sm:$0xff] %v430_v42 }
  0x94   : > { %495 = vst [vmem:[%s1296_s6 + $0x1b8] sm:$0xff] %v431_v44  ;;  %496 = vst [vmem:[%s1296_s6 + $0x1c0] sm:$0xff] %v432_v23 }
  0x95   : > { %497 = vst [vmem:[%s1296_s6 + $0x1c8] sm:$0xff] %v433_v27  ;;  %498 = vst [vmem:[%s1296_s6 + $0x1d0] sm:$0xff] %v434_v45 }
  0x96   : > { %499 = vst [vmem:[%s1296_s6 + $0x1d8] sm:$0xff] %v435_v28  ;;  %500 = vst [vmem:[%s1296_s6 + $0x1e0] sm:$0xff] %v436_v29 }
  0x97   : > { %501 = vst [vmem:[%s1296_s6 + $0x1e8] sm:$0xff] %v437_v30  ;;  %502 = vst [vmem:[%s1296_s6 + $0x1f0] sm:$0xff] %v438_v4 }
  0x98   : > { %503 = vst [vmem:[%s1296_s6 + $0x1f8] sm:$0xff] %v439_v12 }
  0x99   : > { %846 = shalt.err (!%p843_p6)
}
  0x9a   : > { %s847_s22 = scalar_lea.hbm %s1500_s29, 8192  ;;  %s851_s3 = scalar_lea.hbm %s1575_s2, 32768 }
  0x9b   : > { %p848_p12 = scmp.ne.s32.totalorder %s1500_s29, %s847_s22  ;;  %p852_p8 = scmp.lt.u32.totalorder %s1500_s29, %s1575_s2 }
  0x9c   : > { %p853_p10 = scmp.lt.u32.totalorder %s851_s3, %s847_s22  ;;  %p855_p7 = scmp.lt.u32.totalorder %s847_s22, %s1500_s29 }
  0x9d   : > { %p849_p2 = pnand %p848_p12, %p1600_p1 }
  0x9e   : > { %p854_p4 = por %p853_p10, %p852_p8 }
  0x9f   : > { %p850_p5 = pneg %p849_p2 }
  0xa0   : > { %p856_p3 = por %p855_p7, %p854_p4 }
  0xa2   : > { %p857_p9 = pnand %p856_p3, %p850_p5 }
  0xa4   : > { %860 = shalt.err (!%p857_p9)
}
  0xa5   : > { %s967_s27 = smov 2048   ;;  %s968_s23 = smov 4096  }
  0xa6   : > { %s969_s8 = smov 128  }
  0xa7   : > { %664 = dma.vmem_to_hbm [thread:$0]  (%p1600_p1), %s1487_s15, 8192, %s1500_s29, %s505_s30, %s967_s27, %s968_s23, %s969_s8  }
  0xa8 PF: > { %p678_p11 = scmp.ge.s32.totalorder %s959_s19, 2  ;;  %s536_s26 = sand.u32 1, %s931_s12  }
  0xa9   : > { %p1601_p13 = scmp.ne.s32.totalorder %s1595_s25, 0  ;;  %s537_s7 = scalar_lea.sflag [#allocation4], %s536_s26 }
  0xab   : > { %p674_p0 = pnand %p678_p11, %p1601_p13 }
  0xad   : > { %914 = dma.done.wait (!%p674_p0), %s537_s7, 8192  }
  0xae   : > { %916 = vsyncadd (!%p674_p0), %s537_s7, 4294959104  ;;  %s21_s19 = sadd.s32 1, %s959_s19   ;;  %s1602_s24 = sld [smem:[#allocation11_spill]] }
  0xaf   : > { %p18_p6 = scmp.ge.s32.totalorder %s21_s19, 6   ;;  %s1603_s9 = smov %s923_s10 }
  0xb0   : > { %s1604_s10 = smov %s927_s11  ;;  %s1605_s11 = smov %s1149_s4 }
  0xb1   : > { %s1606_s12 = smov %s935_s13  ;;  %s1607_s13 = smov %s939_s14 }
  0xb2   : > { %s1608_s14 = smov %s1154_s5  ;;  %s1609_s15 = smov %s951_s17 }
  0xb3   : > { %s1610_s16 = smov %s955_s18  ;;  %s1611_s17 = smov %s1614_s20 }
  0xb4   : > { %s1612_s18 = smov %s1602_s24  ;;  %20 = sbr.rel (!%p18_p6) target bundleno = 13 (0xd), region = 86 }
  0xbb   :  { %542 = vsyncpa [#allocation3], 1 }
  0xbc   :  { %544 = vsyncpa [#allocation3 + $0x1], 1 }
  0xbd   :  { %545 = vsyncpa [#allocation6], 1 }
  0xbe   :  { %547 = vsyncpa [#allocation6 + $0x1], 1 }
  0xbf   :  { %548 = vsyncpa [#allocation4], 1 }
  0xc0   :  { %550 = vsyncpa [#allocation4 + $0x1], 1 }

</bundles_post_ra>
